<compile_context>
chip_gen: v7x
topology: tpu7x:2x2x1
jax: 0.10.0
libtpu: 0.0.40
codegen_flags: <defaults>
</compile_context>

<pallas_src>
import functools
import math

import jax
import jax.numpy as jnp
from jax.experimental import pallas as pl
from jax.experimental.pallas import tpu as pltpu

F_IN = 79     # real feature count (PyTorch layer1 in_features)
F_PAD = 128   # zero-padded (in VMEM) to a full lane tile / MXU-native K
H1 = 128
H2 = 64


def mlp_kernel(x_ref, w1_ref, b1_ref, w2_ref, b2_ref, w3_ref, b3_ref,
               o_ref, xs_ref):
    cdt = xs_ref.dtype

    # Cast the streamed f32 (tile_b, 79) block into the (tile_b, 128) VMEM
    # scratch and explicitly zero the padding lanes 79..127 every step (VMEM
    # scratch contents are not guaranteed zero, and with a "parallel" grid
    # axis a one-time init keyed on program_id == 0 would not run per-core).
    xs_ref[:, :F_IN] = x_ref[...].astype(cdt)
    xs_ref[:, F_IN:] = jnp.zeros((xs_ref.shape[0], F_PAD - F_IN), cdt)

    # layer1 + ReLU (MXU, f32 accumulation; bias/ReLU in f32)
    h1 = jnp.dot(xs_ref[...], w1_ref[...], preferred_element_type=jnp.float32)
    h1 = jnp.maximum(h1 + b1_ref[...], 0.0)

    # layer2 + ReLU
    h2 = jnp.dot(h1.astype(cdt), w2_ref[...], preferred_element_type=jnp.float32)
    h2 = jnp.maximum(h2 + b2_ref[...], 0.0)

    # output_layer (64 -> 1): broadcast multiply + lane reduction (VPU/XLU)
    # instead of an MXU pass with a single useful output column.
    z_col = jnp.sum(h2 * w3_ref[...], axis=-1, keepdims=True)        # (tile_b, 1)

    # Relayout to a lane-dense (1, tile_b) row (small XLU transpose of tile_b
    # scalars) BEFORE the bias add / sigmoid, so the EUP works on 128-lane
    # dense vregs and the output store is a full-lane store.
    z_row = jnp.transpose(z_col) + b3_ref[...]                        # (1, tile_b)

    # Exact, numerically stable sigmoid on the EUP: 1/(1+e^-z) = 0.5*(1+tanh(z/2)).
    o_ref[...] = (0.5 * (jnp.tanh(0.5 * z_row) + 1.0)).astype(o_ref.dtype)


def _round_up(n, m):
    return (n + m - 1) // m * m


@functools.partial(jax.jit, static_argnames=("tile_b", "compute_dtype"))
def mlp_forward(x, params, *, tile_b=2048, compute_dtype=jnp.bfloat16):
    w1, b1, w2, b2, w3, b3 = params
    B = x.shape[0]

    # Batch tile: multiple of 128 (lane-dense output row + bf16 (16,128)
    # packing), large by default to amortize per-step overhead, but capped so
    # the grid keeps >= 2 steps when B allows (v7x megacore sharding).
    tile_b = _round_up(max(tile_b, 128), 128)
    if B > 256:
        tile_b = min(tile_b, _round_up(pl.cdiv(B, 2), 128))
    tile_b = min(tile_b, _round_up(B, 128))
    num_tiles = pl.cdiv(B, tile_b)

    # Weights/biases: tiny, prepped once per call.  Stored (in, out); w1 is
    # zero-padded on K (79 -> 128); w3 becomes a (1, 64) f32 row so the kernel
    # does no per-step cast/broadcast of it.
    w1p = jnp.pad(w1, ((0, F_PAD - F_IN), (0, 0))).astype(compute_dtype)
    w2c = w2.astype(compute_dtype)
    w3r = w3.reshape(1, H2).astype(jnp.float32)
    b1c = b1.reshape(1, H1).astype(jnp.float32)
    b2c = b2.reshape(1, H2).astype(jnp.float32)
    b3c = b3.reshape(1, 1).astype(jnp.float32)

    const = lambda i: (0, 0)          # weights/biases stay VMEM-resident

    itm = jnp.dtype(compute_dtype).itemsize
    n_rows = num_tiles * tile_b

    # VMEM footprint is a few MiB even at tile_b=4096 -- far below v7x's
    # 64 MiB -- so tile size is never VMEM-constrained for this kernel.
    vmem_bytes = (2 * tile_b * F_IN * x.dtype.itemsize    # double-buffered x
                  + tile_b * F_PAD * itm                  # scratch
                  + 2 * tile_b * 4                        # double-buffered output row
                  + (F_PAD * H1 + H1 * H2) * itm + (H1 + 2 * H2 + 1) * 4)
    assert vmem_bytes < 32 * 1024 * 1024, vmem_bytes

    cost = pl.CostEstimate(
        flops=2 * n_rows * (F_PAD * H1 + H1 * H2 + H2),
        transcendentals=n_rows,                           # one tanh per row
        bytes_accessed=(B * F_IN * x.dtype.itemsize       # x streamed once (f32)
                        + n_rows * 4                      # lane-dense f32 output
                        + (F_PAD * H1 + H1 * H2) * itm    # weights
                        + (H1 + 2 * H2 + 1) * 4),         # biases + w3 row
    )

    out = pl.pallas_call(
        mlp_kernel,
        out_shape=jax.ShapeDtypeStruct((num_tiles, 1, tile_b), jnp.float32),
        grid=(num_tiles,),
        in_specs=[
            # x streamed as-is (f32, full 79-lane extent == array dim): no
            # wrapper-side pad/cast pass over the dominant HBM operand.
            # NOTE: on v5e, if a profile shows exposed x DMA, add
            #       pipeline_mode=pl.Buffered(3) to this spec only.
            pl.BlockSpec((tile_b, F_IN), lambda i: (i, 0)),
            pl.BlockSpec((F_PAD, H1), const),             # w1 (K-padded)
            pl.BlockSpec((1, H1), const),                 # b1
            pl.BlockSpec((H1, H2), const),                # w2
            pl.BlockSpec((1, H2), const),                 # b2
            pl.BlockSpec((1, H2), const),                 # w3 row (f32)
            pl.BlockSpec((1, 1), const),                  # b3
        ],
        # Lane-dense output: one (1, tile_b) f32 row per grid step.
        out_specs=pl.BlockSpec((None, 1, tile_b), lambda i: (i, 0, 0)),
        scratch_shapes=[pltpu.VMEM((tile_b, F_PAD), compute_dtype)],
        compiler_params=pltpu.CompilerParams(
            dimension_semantics=("parallel",),            # megacore shard on v7x
            vmem_limit_bytes=32 * 1024 * 1024,
        ),
        cost_estimate=cost,
    )(x, w1p, b1c, w2c, b2c, w3r, b3c)

    # (num_tiles, 1, tile_b) -> (B, 1); garbage rows from the ragged last tile
    # are sliced off here.
    return out.reshape(num_tiles * tile_b, 1)[:B]


def init_linear(key, fan_in, fan_out):
    # PyTorch nn.Linear default init: U(-1/sqrt(fan_in), 1/sqrt(fan_in)).
    kw, kb = jax.random.split(key)
    bound = 1.0 / math.sqrt(fan_in)
    w = jax.random.uniform(kw, (fan_in, fan_out), jnp.float32, -bound, bound)
    b = jax.random.uniform(kb, (fan_out,), jnp.float32, -bound, bound)
    return w, b


if __name__ == "__main__":
    key = jax.random.PRNGKey(0)
    k_x, k1, k2, k3 = jax.random.split(key, 4)

    # Small deterministic example: 300 rows -> tile_b clamps to 256, giving a
    # 2-step grid (megacore-shardable) with a ragged last tile.
    batch = 300
    x = jax.random.normal(k_x, (batch, F_IN), dtype=jnp.float32)

    w1, b1 = init_linear(k1, F_IN, H1)
    w2, b2 = init_linear(k2, H1, H2)
    w3, b3 = init_linear(k3, H2, 1)
    params = (w1, b1, w2, b2, w3, b3)

    out = jax.block_until_ready(mlp_forward(x, params))

    # pure-f32 JAX reference of the PyTorch module forward
    h1 = jnp.maximum(x @ w1 + b1, 0.0)
    h2 = jnp.maximum(h1 @ w2 + b2, 0.0)
    ref = jax.nn.sigmoid(h2 @ w3 + b3)

    assert out.shape == (batch, 1)
    # bf16 matmuls (f32 accumulation) vs f32 reference.
    assert float(jnp.max(jnp.abs(out - ref))) < 2e-2

    # precision cross-check: same kernel in pure f32 compute.
    out_f32 = jax.block_until_ready(
        mlp_forward(x, params, compute_dtype=jnp.float32))
    assert out_f32.shape == (batch, 1)
    assert float(jnp.max(jnp.abs(out_f32 - ref))) < 1e-2

    print("KERNEL_OK")
</pallas_src>

<mosaic_0001>
module attributes {stable_mosaic.version = 11 : i64} {
  func.func @mlp_kernel(%arg0: i32, %arg1: memref<256x79xf32, #tpu.memory_space<vmem>>, %arg2: memref<128x128xbf16, #tpu.memory_space<vmem>>, %arg3: memref<1x128xf32, #tpu.memory_space<vmem>>, %arg4: memref<128x64xbf16, #tpu.memory_space<vmem>>, %arg5: memref<1x64xf32, #tpu.memory_space<vmem>>, %arg6: memref<1x64xf32, #tpu.memory_space<vmem>>, %arg7: memref<1x1xf32, #tpu.memory_space<vmem>>, %arg8: memref<1x1x256xf32, #tpu.memory_space<vmem>>, %arg9: memref<256x128xbf16, #tpu.memory_space<vmem>>) attributes {dimension_semantics = [#tpu.dimension_semantics<parallel>], iteration_bounds = array<i64: 2>, scalar_prefetch = 0 : i64, scratch_operands = 1 : i64, tpu.core_type = #tpu.core_type<tc>, window_params = [{transform_indices = @transform_0, window_bounds = array<i64: 256, 79>}, {pipeline_mode = #tpu.pipeline_mode<synchronous>, transform_indices = @transform_1, window_bounds = array<i64: 128, 128>}, {pipeline_mode = #tpu.pipeline_mode<synchronous>, transform_indices = @transform_2, window_bounds = array<i64: 1, 128>}, {pipeline_mode = #tpu.pipeline_mode<synchronous>, transform_indices = @transform_3, window_bounds = array<i64: 128, 64>}, {pipeline_mode = #tpu.pipeline_mode<synchronous>, transform_indices = @transform_4, window_bounds = array<i64: 1, 64>}, {pipeline_mode = #tpu.pipeline_mode<synchronous>, transform_indices = @transform_5, window_bounds = array<i64: 1, 64>}, {pipeline_mode = #tpu.pipeline_mode<synchronous>, transform_indices = @transform_6, window_bounds = array<i64: 1, 1>}, {transform_indices = @transform_7, window_bounds = array<i64: 1, 1, 256>}]} {
    %c0 = arith.constant 0 : index
    %c0_0 = arith.constant 0 : index
    %0 = vector.load %arg1[%c0, %c0_0] : memref<256x79xf32, #tpu.memory_space<vmem>>, vector<256x79xf32>
    %1 = arith.truncf %0 : vector<256x79xf32> to vector<256x79xbf16>
    %c0_1 = arith.constant 0 : index
    %c0_2 = arith.constant 0 : index
    %2 = vector.load %arg9[%c0_1, %c0_2] : memref<256x128xbf16, #tpu.memory_space<vmem>>, vector<256x79xbf16>
    tpu.vector_store %arg9[%c0_1, %c0_2], %1 {strides = array<i32>} : memref<256x128xbf16, #tpu.memory_space<vmem>>, vector<256x79xbf16>,
    %cst = arith.constant 0.000000e+00 : bf16
    %3 = vector.broadcast %cst : bf16 to vector<256x49xbf16>
    %c0_3 = arith.constant 0 : index
    %c79 = arith.constant 79 : index
    %4 = vector.load %arg9[%c0_3, %c79] : memref<256x128xbf16, #tpu.memory_space<vmem>>, vector<256x49xbf16>
    tpu.vector_store %arg9[%c0_3, %c79], %3 {strides = array<i32>} : memref<256x128xbf16, #tpu.memory_space<vmem>>, vector<256x49xbf16>,
    %c0_4 = arith.constant 0 : index
    %c0_5 = arith.constant 0 : index
    %5 = vector.load %arg9[%c0_4, %c0_5] : memref<256x128xbf16, #tpu.memory_space<vmem>>, vector<256x128xbf16>
    %c0_6 = arith.constant 0 : index
    %c0_7 = arith.constant 0 : index
    %6 = vector.load %arg2[%c0_6, %c0_7] : memref<128x128xbf16, #tpu.memory_space<vmem>>, vector<128x128xbf16>
    %cst_8 = arith.constant dense<0.000000e+00> : vector<256x128xf32>
    %7 = tpu.matmul %5, %6, %cst_8 {dimension_numbers = #tpu.dot_dimension_numbers<[1], [0], [0], [1], [0, 0, 1, 1], [], []>} : vector<256x128xbf16>, vector<128x128xbf16>, vector<256x128xf32> -> vector<256x128xf32>
    %c0_9 = arith.constant 0 : index
    %c0_10 = arith.constant 0 : index
    %8 = vector.load %arg3[%c0_9, %c0_10] : memref<1x128xf32, #tpu.memory_space<vmem>>, vector<1x128xf32>
    %9 = vector.broadcast %8 : vector<1x128xf32> to vector<256x128xf32>
    %10 = arith.addf %7, %9 : vector<256x128xf32>
    %cst_11 = arith.constant 0.000000e+00 : f32
    %11 = vector.broadcast %cst_11 : f32 to vector<256x128xf32>
    %12 = arith.maximumf %10, %11 : vector<256x128xf32>
    %13 = arith.truncf %12 : vector<256x128xf32> to vector<256x128xbf16>
    %c0_12 = arith.constant 0 : index
    %c0_13 = arith.constant 0 : index
    %14 = vector.load %arg4[%c0_12, %c0_13] : memref<128x64xbf16, #tpu.memory_space<vmem>>, vector<128x64xbf16>
    %cst_14 = arith.constant dense<0.000000e+00> : vector<256x64xf32>
    %15 = tpu.matmul %13, %14, %cst_14 {dimension_numbers = #tpu.dot_dimension_numbers<[1], [0], [0], [1], [0, 0, 1, 1], [], []>} : vector<256x128xbf16>, vector<128x64xbf16>, vector<256x64xf32> -> vector<256x64xf32>
    %c0_15 = arith.constant 0 : index
    %c0_16 = arith.constant 0 : index
    %16 = vector.load %arg5[%c0_15, %c0_16] : memref<1x64xf32, #tpu.memory_space<vmem>>, vector<1x64xf32>
    %17 = vector.broadcast %16 : vector<1x64xf32> to vector<256x64xf32>
    %18 = arith.addf %15, %17 : vector<256x64xf32>
    %cst_17 = arith.constant 0.000000e+00 : f32
    %19 = vector.broadcast %cst_17 : f32 to vector<256x64xf32>
    %20 = arith.maximumf %18, %19 : vector<256x64xf32>
    %c0_18 = arith.constant 0 : index
    %c0_19 = arith.constant 0 : index
    %21 = vector.load %arg6[%c0_18, %c0_19] : memref<1x64xf32, #tpu.memory_space<vmem>>, vector<1x64xf32>
    %22 = vector.broadcast %21 : vector<1x64xf32> to vector<256x64xf32>
    %23 = arith.mulf %20, %22 : vector<256x64xf32>
    %cst_20 = arith.constant dense<0.000000e+00> : vector<256xf32>
    %24 = vector.multi_reduction <add>, %23, %cst_20 [1] : vector<256x64xf32> to vector<256xf32>
    %25 = vector.shape_cast %24 : vector<256xf32> to vector<256x1xf32>
    %26 = tpu.transpose %25, [1, 0] : vector<256x1xf32> -> vector<1x256xf32>
    %c0_21 = arith.constant 0 : index
    %c0_22 = arith.constant 0 : index
    %27 = vector.load %arg7[%c0_21, %c0_22] : memref<1x1xf32, #tpu.memory_space<vmem>>, vector<1x1xf32>
    %28 = vector.broadcast %27 : vector<1x1xf32> to vector<1x256xf32>
    %29 = arith.addf %26, %28 : vector<1x256xf32>
    %cst_23 = arith.constant 5.000000e-01 : f32
    %30 = vector.broadcast %cst_23 : f32 to vector<1x256xf32>
    %31 = arith.mulf %30, %29 : vector<1x256xf32>
    %32 = math.tanh %31 : vector<1x256xf32>
    %cst_24 = arith.constant 1.000000e+00 : f32
    %33 = vector.broadcast %cst_24 : f32 to vector<1x256xf32>
    %34 = arith.addf %32, %33 : vector<1x256xf32>
    %cst_25 = arith.constant 5.000000e-01 : f32
    %35 = vector.broadcast %cst_25 : f32 to vector<1x256xf32>
    %36 = arith.mulf %35, %34 : vector<1x256xf32>
    %c0_26 = arith.constant 0 : index
    %c0_27 = arith.constant 0 : index
    %c0_28 = arith.constant 0 : index
    %37 = vector.load %arg8[%c0_26, %c0_27, %c0_28] : memref<1x1x256xf32, #tpu.memory_space<vmem>>, vector<1x1x256xf32>
    %38 = vector.shape_cast %37 : vector<1x1x256xf32> to vector<1x256xf32>
    %39 = vector.shape_cast %36 : vector<1x256xf32> to vector<1x1x256xf32>
    tpu.vector_store %arg8[%c0_26, %c0_27, %c0_28], %39 {strides = array<i32>} : memref<1x1x256xf32, #tpu.memory_space<vmem>>, vector<1x1x256xf32>,
    return
  }
  func.func @transform_0(%arg0: i32) -> (i32, i32) {
    %c0_i32 = arith.constant 0 : i32
    %c0_i32_0 = arith.constant 0 : i32
    return %arg0, %c0_i32 : i32, i32
  }
  func.func @transform_1(%arg0: i32) -> (i32, i32) {
    %c0_i32 = arith.constant 0 : i32
    %c0_i32_0 = arith.constant 0 : i32
    %c0_i32_1 = arith.constant 0 : i32
    return %c0_i32, %c0_i32_0 : i32, i32
  }
  func.func @transform_2(%arg0: i32) -> (i32, i32) {
    %c0_i32 = arith.constant 0 : i32
    %c0_i32_0 = arith.constant 0 : i32
    %c0_i32_1 = arith.constant 0 : i32
    return %c0_i32, %c0_i32_0 : i32, i32
  }
  func.func @transform_3(%arg0: i32) -> (i32, i32) {
    %c0_i32 = arith.constant 0 : i32
    %c0_i32_0 = arith.constant 0 : i32
    %c0_i32_1 = arith.constant 0 : i32
    return %c0_i32, %c0_i32_0 : i32, i32
  }
  func.func @transform_4(%arg0: i32) -> (i32, i32) {
    %c0_i32 = arith.constant 0 : i32
    %c0_i32_0 = arith.constant 0 : i32
    %c0_i32_1 = arith.constant 0 : i32
    return %c0_i32, %c0_i32_0 : i32, i32
  }
  func.func @transform_5(%arg0: i32) -> (i32, i32) {
    %c0_i32 = arith.constant 0 : i32
    %c0_i32_0 = arith.constant 0 : i32
    %c0_i32_1 = arith.constant 0 : i32
    return %c0_i32, %c0_i32_0 : i32, i32
  }
  func.func @transform_6(%arg0: i32) -> (i32, i32) {
    %c0_i32 = arith.constant 0 : i32
    %c0_i32_0 = arith.constant 0 : i32
    %c0_i32_1 = arith.constant 0 : i32
    return %c0_i32, %c0_i32_0 : i32, i32
  }
  func.func @transform_7(%arg0: i32) -> (i32, i32, i32) {
    %c0_i32 = arith.constant 0 : i32
    %c0_i32_0 = arith.constant 0 : i32
    %c0_i32_1 = arith.constant 0 : i32
    return %arg0, %c0_i32, %c0_i32_0 : i32, i32, i32
  }
}

</mosaic_0001>

<bundles_post_ra>
// kernel: mlp_forward.1
= control target key start
LH: loop header
LB: loop body
LE: loop exit
PB: predicated region body
PF: predicated region fallthrough
CT: control target
= control target key end

     0   :  { %s1498_s26 = smov 0   ;;  %s1805_s0 = inlined_call_operand.vmem [shape: f32[300,79], index: 0, kind: input, shape index: {}]   ;;  %s1806_s1 = inlined_call_operand.vmem [shape: bf16[128,128], index: 1, kind: input, shape index: {}]   ;;  %s1807_s2 = inlined_call_operand.vmem [shape: f32[1,128], index: 2, kind: input, shape index: {}]   ;;  %s1808_s3 = inlined_call_operand.vmem [shape: bf16[128,64], index: 3, kind: input, shape index: {}]   ;;  %s1809_s4 = inlined_call_operand.vmem [shape: f32[1,64], index: 4, kind: input, shape index: {}]   ;;  %s1810_s5 = inlined_call_operand.vmem [shape: f32[1,64], index: 5, kind: input, shape index: {}]   ;;  %s1811_s6 = inlined_call_operand.<no memory space> [shape: f32[1,1], index: 6, kind: input, shape index: {}]   ;;  %s1812_s7 = inlined_call_operand.vmem [shape: f32[2,1,256], index: 7, kind: output, shape index: {}]  }
   0x1   :  { %v12_v0 = vstv %s1811_s6 }
   0x2   :  { %13 = vst [vmem:[#allocation3] sm:$0x1] %v12_v0 }
   0x3 LB: > { %s1504_s27 = sadd.s32 4294967295, %s1451_s26   ;;  %p1244_p0 = scmp.ge.s32.totalorder %s1451_s26, 1  ;;  %s1451_s26 = sphi %s1498_s26, %s19_s26  }
   0x4   : > { %p248_p1 = scmp.lt.s32.totalorder %s1451_s26, 3 }
   0x6   : > { %p249_p2 = pnand %p1244_p0, %p248_p1 }
   0x7   : > { %v1425_v1 = vld [vmem:[%s1806_s1] sm:$0xff] (!%p249_p2)   ;;  %s1245_s6 = sshll.u32 (!%p249_p2), %s1504_s27, 5  ;;  %v1426_v2 = vld [vmem:[%s1806_s1 + $0x8] sm:$0xff] (!%p249_p2)   ;;  %v1427_v3 = vld [vmem:[%s1806_s1 + $0x10] sm:$0xff] (!%p249_p2)   ;;  %v1453_v5 = vmov (!%p249_p2), 0   ;;  %vm350_vm0 = vcmask (!%p249_p2), 646144  }
   0x8   : > { %252 = sbr.rel (%p249_p2) target bundleno = 839 (0x347), region = 48  ;;  %p288_p3 = scmp.lt.s32.totalorder (!%p249_p2), %s1245_s6, 37  ;;  %1317 = vmatprep.subr.bf16.mxu0 (!%p249_p2), %v1425_v1  ;;  %v1428_v4 = vld [vmem:[%s1806_s1 + $0x18] sm:$0xff] (!%p249_p2)   ;;  %1423 = vset.pattern.permute.xlu1 (!%p249_p2), %v1453_v5  ;;  %vm367_vm1 = vcmask (!%p249_p2), 1048184   ;;  %v1536_v13 = vld [vmem:[%s1806_s1 + $0x20] sm:$0xff] (!%p249_p2)   ;;  %v1430_v32 = vld [vmem:[%s1806_s1 + $0x28] sm:$0xff] (!%p249_p2)  }
   0x9   : > { %1318 = vmatpush3.bf16.msra.mxu0 (!%p249_p2), %v1425_v1  ;;  %v1433_v57 = vld [vmem:[%s1808_s3] sm:$0xff] (!%p249_p2)   ;;  %v1431_v58 = vld [vmem:[%s1806_s1 + $0x30] sm:$0xff] (!%p249_p2)   ;;  %v1434_v59 = vld [vmem:[%s1808_s3 + $0x8] sm:$0xff] (!%p249_p2)   ;;  %vm983_vm2 = vcmask (!%p249_p2), 523264   ;;  %p297_p4 = scmp.lt.s32.totalorder (!%p249_p2), %s1504_s27, 1 }
   0xa   : > { %1319 = vmatprep.subr.bf16.mxu0 (!%p249_p2), %v1426_v2  ;;  %1365 = vmatprep.subr.bf16.mxu1 (!%p249_p2), %v1433_v57  ;;  %v1435_v60 = vld [vmem:[%s1808_s3 + $0x10] sm:$0xff] (!%p249_p2)   ;;  %v1432_v61 = vld [vmem:[%s1806_s1 + $0x38] sm:$0xff] (!%p249_p2)   ;;  %v1437_v0 = vld [vmem:[%s1808_s3 + $0x20] sm:$0xff] (!%p249_p2)  }
   0xb   : > { %1366 = vmatpush3.bf16.msra.mxu1 (!%p249_p2), %v1433_v57  ;;  %v1436_v62 = vld [vmem:[%s1808_s3 + $0x18] sm:$0xff] (!%p249_p2)  }
   0xc   : > { %1367 = vmatprep.subr.bf16.mxu1 (!%p249_p2), %v1434_v59 }
   0xd   : > { %1320 = vmatpush3.bf16.msra.mxu0 (!%p249_p2), %v1426_v2  ;;  %v1438_v2 = vld [vmem:[%s1808_s3 + $0x28] sm:$0xff] (!%p249_p2)  }
   0xe   : > { %1321 = vmatprep.subr.bf16.mxu0 (!%p249_p2), %v1427_v3 }
   0xf   : > { %s1814_s6 = smov (!%p288_p3, %s1245_s6), 37  ;;  %1368 = vmatpush3.bf16.msra.mxu1 %v1434_v59  ;;  %s1816_s27 = smov (!%p297_p4, %s1504_s27), 1 }
  0x10   : > { %s1246_s11 = sshll.u32 %s1814_s6, 3  ;;  %1369 = vmatprep.subr.bf16.mxu1 %v1435_v60  ;;  %s1247_s25 = sshll.u32 %s1816_s27, 1 }
  0x11   : > { %s1521_s14 = scalar_lea.vmem %s1805_s0, %s1246_s11  ;;  %1322 = vmatpush3.bf16.msra.mxu0 %v1427_v3  ;;  %s300_s6 = scalar_lea.vmem %s1812_s7, %s1247_s25 }
  0x12   : > { %v302_v6 = vld [vmem:[%s1521_s14] sm:$0xff]  ;;  %v303_v7 = vld [vmem:[%s1521_s14 + $0x8] sm:$0xff]  ;;  %v304_v8 = vld [vmem:[%s1521_s14 + $0x10] sm:$0xff]  ;;  %1323 = vmatprep.subr.bf16.mxu0 %v1428_v4 }
  0x13   : > { %v334_v9 = vpack.c.bf16 %v303_v7, %v302_v6  ;;  %v305_v10 = vld [vmem:[%s1521_s14 + $0x18] sm:$0xff]  ;;  %v306_v11 = vld [vmem:[%s1521_s14 + $0x20] sm:$0xff]  ;;  %v307_v12 = vld [vmem:[%s1521_s14 + $0x28] sm:$0xff]  ;;  %1370 = vmatpush3.bf16.msra.mxu1 %v1435_v60 }
  0x14   : > { %v335_v14 = vpack.c.bf16 %v305_v10, %v304_v8  ;;  %v336_v15 = vpack.c.bf16 %v307_v12, %v306_v11  ;;  %v308_v16 = vld [vmem:[%s1521_s14 + $0x30] sm:$0xff]  ;;  %v309_v17 = vld [vmem:[%s1521_s14 + $0x38] sm:$0xff]  ;;  %v310_v18 = vld [vmem:[%s1521_s14 + $0x40] sm:$0xff]  ;;  %1371 = vmatprep.subr.bf16.mxu1 %v1436_v62 }
  0x15   : > { %351 = vst.msk [vmem:[#allocation2] sm:$0xff] %vm350_vm0, %v334_v9  ;;  %v337_v19 = vpack.c.bf16 %v309_v17, %v308_v16  ;;  %v311_v20 = vld [vmem:[%s1521_s14 + $0x48] sm:$0xff]  ;;  %v312_v21 = vld [vmem:[%s1521_s14 + $0x50] sm:$0xff]  ;;  %v313_v22 = vld [vmem:[%s1521_s14 + $0x58] sm:$0xff]  ;;  %1324 = vmatpush3.bf16.msra.mxu0 %v1428_v4 }
  0x16   : > { %368 = vst.msk [vmem:[#allocation2] sm:$0xff] %vm367_vm1, %v1453_v5  ;;  %v338_v23 = vpack.c.bf16 %v311_v20, %v310_v18  ;;  %v339_v24 = vpack.c.bf16 %v313_v22, %v312_v21  ;;  %v314_v25 = vld [vmem:[%s1521_s14 + $0x60] sm:$0xff]  ;;  %v315_v26 = vld [vmem:[%s1521_s14 + $0x68] sm:$0xff]  ;;  %v316_v27 = vld [vmem:[%s1521_s14 + $0x70] sm:$0xff]  ;;  %1325 = vmatprep.subr.bf16.mxu0 %v1536_v13 }
  0x17   : > { %352 = vst.msk [vmem:[#allocation2 + $0x8] sm:$0xff] %vm350_vm0, %v335_v14  ;;  %353 = vst.msk [vmem:[#allocation2 + $0x10] sm:$0xff] %vm350_vm0, %v336_v15  ;;  %v340_v28 = vpack.c.bf16 %v315_v26, %v314_v25  ;;  %v317_v29 = vld [vmem:[%s1521_s14 + $0x78] sm:$0xff]  ;;  %v318_v30 = vld [vmem:[%s1521_s14 + $0x80] sm:$0xff]  ;;  %1372 = vmatpush3.bf16.msra.mxu1 %v1436_v62 }
  0x18   : > { %369 = vst.msk [vmem:[#allocation2 + $0x8] sm:$0xff] %vm367_vm1, %v1453_v5  ;;  %370 = vst.msk [vmem:[#allocation2 + $0x10] sm:$0xff] %vm367_vm1, %v1453_v5  ;;  %v319_v31 = vld [vmem:[%s1521_s14 + $0x88] sm:$0xff]  ;;  %v341_v33 = vpack.c.bf16 %v317_v29, %v316_v27  ;;  %v320_v35 = vld [vmem:[%s1521_s14 + $0x90] sm:$0xff]  ;;  %1373 = vmatprep.subr.bf16.mxu1 %v1437_v0 }
  0x19   : > { %354 = vst.msk [vmem:[#allocation2 + $0x18] sm:$0xff] %vm350_vm0, %v337_v19  ;;  %355 = vst.msk [vmem:[#allocation2 + $0x20] sm:$0xff] %vm350_vm0, %v338_v23  ;;  %v342_v34 = vpack.c.bf16 %v319_v31, %v318_v30  ;;  %v321_v36 = vld [vmem:[%s1521_s14 + $0x98] sm:$0xff]  ;;  %v322_v37 = vld [vmem:[%s1521_s14 + $0xa0] sm:$0xff]  ;;  %1326 = vmatpush3.bf16.msra.mxu0 %v1536_v13 }
  0x1a   : > { %371 = vst.msk [vmem:[#allocation2 + $0x18] sm:$0xff] %vm367_vm1, %v1453_v5  ;;  %372 = vst.msk [vmem:[#allocation2 + $0x20] sm:$0xff] %vm367_vm1, %v1453_v5  ;;  %v343_v38 = vpack.c.bf16 %v321_v36, %v320_v35  ;;  %v323_v39 = vld [vmem:[%s1521_s14 + $0xa8] sm:$0xff]  ;;  %v324_v40 = vld [vmem:[%s1521_s14 + $0xb0] sm:$0xff]  ;;  %1327 = vmatprep.subr.bf16.mxu0 %v1430_v32 }
  0x1b   : > { %356 = vst.msk [vmem:[#allocation2 + $0x28] sm:$0xff] %vm350_vm0, %v339_v24  ;;  %357 = vst.msk [vmem:[#allocation2 + $0x30] sm:$0xff] %vm350_vm0, %v340_v28  ;;  %v325_v41 = vld [vmem:[%s1521_s14 + $0xb8] sm:$0xff]  ;;  %v344_v42 = vpack.c.bf16 %v323_v39, %v322_v37  ;;  %v326_v44 = vld [vmem:[%s1521_s14 + $0xc0] sm:$0xff]  ;;  %1374 = vmatpush3.bf16.msra.mxu1 %v1437_v0 }
  0x1c   : > { %373 = vst.msk [vmem:[#allocation2 + $0x28] sm:$0xff] %vm367_vm1, %v1453_v5  ;;  %374 = vst.msk [vmem:[#allocation2 + $0x30] sm:$0xff] %vm367_vm1, %v1453_v5  ;;  %v345_v43 = vpack.c.bf16 %v325_v41, %v324_v40  ;;  %v327_v45 = vld [vmem:[%s1521_s14 + $0xc8] sm:$0xff]  ;;  %v328_v46 = vld [vmem:[%s1521_s14 + $0xd0] sm:$0xff]  ;;  %1375 = vmatprep.subr.bf16.mxu1 %v1438_v2 }
  0x1d   : > { %358 = vst.msk [vmem:[#allocation2 + $0x38] sm:$0xff] %vm350_vm0, %v341_v33  ;;  %359 = vst.msk [vmem:[#allocation2 + $0x40] sm:$0xff] %vm350_vm0, %v342_v34  ;;  %v346_v47 = vpack.c.bf16 %v327_v45, %v326_v44  ;;  %v329_v48 = vld [vmem:[%s1521_s14 + $0xd8] sm:$0xff]  ;;  %v330_v49 = vld [vmem:[%s1521_s14 + $0xe0] sm:$0xff]  ;;  %1328 = vmatpush3.bf16.msra.mxu0 %v1430_v32 }
  0x1e   : > { %375 = vst.msk [vmem:[#allocation2 + $0x38] sm:$0xff] %vm367_vm1, %v1453_v5  ;;  %376 = vst.msk [vmem:[#allocation2 + $0x40] sm:$0xff] %vm367_vm1, %v1453_v5  ;;  %v331_v50 = vld [vmem:[%s1521_s14 + $0xe8] sm:$0xff]  ;;  %v347_v51 = vpack.c.bf16 %v329_v48, %v328_v46  ;;  %v332_v53 = vld [vmem:[%s1521_s14 + $0xf0] sm:$0xff]  ;;  %1329 = vmatprep.subr.bf16.mxu0 %v1431_v58 }
  0x1f   : > { %360 = vst.msk [vmem:[#allocation2 + $0x48] sm:$0xff] %vm350_vm0, %v343_v38  ;;  %361 = vst.msk [vmem:[#allocation2 + $0x50] sm:$0xff] %vm350_vm0, %v344_v42  ;;  %v348_v52 = vpack.c.bf16 %v331_v50, %v330_v49  ;;  %v333_v54 = vld [vmem:[%s1521_s14 + $0xf8] sm:$0xff]  ;;  %v384_v55 = vld [vmem:[#allocation2] sm:$0xff]  ;;  %1376 = vmatpush3.bf16.msra.mxu1 %v1438_v2 }
  0x20   : > { %377 = vst.msk [vmem:[#allocation2 + $0x48] sm:$0xff] %vm367_vm1, %v1453_v5  ;;  %378 = vst.msk [vmem:[#allocation2 + $0x50] sm:$0xff] %vm367_vm1, %v1453_v5  ;;  %v349_v56 = vpack.c.bf16 %v333_v54, %v332_v53  ;;  %1333 = vmatprep.mubr.bf16.mxu0 %v384_v55  ;;  %v385_v63 = vld [vmem:[#allocation2 + $0x8] sm:$0xff]  ;;  %v386_v1 = vld [vmem:[#allocation2 + $0x10] sm:$0xff] }
  0x21   : > { %362 = vst.msk [vmem:[#allocation2 + $0x58] sm:$0xff] %vm350_vm0, %v345_v43  ;;  %363 = vst.msk [vmem:[#allocation2 + $0x60] sm:$0xff] %vm350_vm0, %v346_v47  ;;  %1330 = vmatpush3.bf16.msra.mxu0 %v1431_v58  ;;  %v387_v3 = vld [vmem:[#allocation2 + $0x18] sm:$0xff]  ;;  %v388_v4 = vld [vmem:[#allocation2 + $0x20] sm:$0xff] }
  0x22   : > { %379 = vst.msk [vmem:[#allocation2 + $0x58] sm:$0xff] %vm367_vm1, %v1453_v5  ;;  %380 = vst.msk [vmem:[#allocation2 + $0x60] sm:$0xff] %vm367_vm1, %v1453_v5  ;;  %1331 = vmatprep.subr.bf16.mxu0 %v1432_v61  ;;  %v1439_v17 = vld [vmem:[%s1808_s3 + $0x30] sm:$0xff]   ;;  %v1440_v18 = vld [vmem:[%s1808_s3 + $0x38] sm:$0xff]  }
  0x23   : > { %364 = vst.msk [vmem:[#allocation2 + $0x68] sm:$0xff] %vm350_vm0, %v347_v51  ;;  %365 = vst.msk [vmem:[#allocation2 + $0x70] sm:$0xff] %vm350_vm0, %v348_v52  ;;  %v389_v6 = vld [vmem:[#allocation2 + $0x28] sm:$0xff]  ;;  %v390_v7 = vld [vmem:[#allocation2 + $0x30] sm:$0xff]  ;;  %1377 = vmatprep.subr.bf16.mxu1 %v1439_v17 }
  0x24   : > { %381 = vst.msk [vmem:[#allocation2 + $0x68] sm:$0xff] %vm367_vm1, %v1453_v5  ;;  %382 = vst.msk [vmem:[#allocation2 + $0x70] sm:$0xff] %vm367_vm1, %v1453_v5  ;;  %1378 = vmatpush3.bf16.msra.mxu1 %v1439_v17  ;;  %v1144_v19 = vld [vmem:[#allocation3] sm:$0x1] }
  0x25   : > { %366 = vst.msk [vmem:[#allocation2 + $0x78] sm:$0xff] %vm350_vm0, %v349_v56  ;;  %1332 = vmatpush3.bf16.msra.mxu0 %v1432_v61  ;;  %v391_v8 = vld [vmem:[#allocation2 + $0x38] sm:$0xff]  ;;  %v392_v9 = vld [vmem:[#allocation2 + $0x40] sm:$0xff]  ;;  %1379 = vmatprep.subr.bf16.mxu1 %v1440_v18 }
  0x26   : > { %383 = vst.msk [vmem:[#allocation2 + $0x78] sm:$0xff] %vm367_vm1, %v1453_v5  ;;  %1147 = vperm.xlu1 %1423, %v1144_v19   ;;  %v1650_v20 = vld [vmem:[%s1807_s2] ss:$0 sm:$0xff] }
  0x27   : > { %v393_v10 = vld [vmem:[#allocation2 + $0x48] sm:$0xff]  ;;  %v394_v11 = vld [vmem:[#allocation2 + $0x50] sm:$0xff] }
  0x28   : > { %1334 = vmatmul.mubr.bf16.vlgmr.msra.gmra.mrb[0].mxu0 %v385_v63  ;;  %1380 = vmatpush3.bf16.msra.mxu1 %v1440_v18 }
  0x29   : > { %1337 = vmatprep.mubr.bf16.mxu0 %v386_v1  ;;  %v395_v12 = vld [vmem:[#allocation2 + $0x58] sm:$0xff]  ;;  %v396_v13 = vld [vmem:[#allocation2 + $0x60] sm:$0xff] }
  0x2b   : > { %v397_v14 = vld [vmem:[#allocation2 + $0x68] sm:$0xff]  ;;  %v398_v15 = vld [vmem:[#allocation2 + $0x70] sm:$0xff] }
  0x2d   : > { %v399_v16 = vld [vmem:[#allocation2 + $0x78] sm:$0xff] }
  0x30   : > { %1338 = vmatmul.mubr.bf16.gmra.mrb[4].mxu0 %v387_v3 }
  0x31   : > { %1341 = vmatprep.mubr.bf16.mxu0 %v388_v4 }
  0x38   : > { %1342 = vmatmul.mubr.bf16.gmra.mrb[8].mxu0 %v389_v6 }
  0x39   : > { %1345 = vmatprep.mubr.bf16.mxu0 %v390_v7 }
  0x40   : > { %1346 = vmatmul.mubr.bf16.gmra.mrb[12].mxu0 %v391_v8 }
  0x41   : > { %1349 = vmatprep.mubr.bf16.mxu0 %v392_v9 }
  0x48   : > { %1350 = vmatmul.mubr.bf16.gmra.mrb[16].mxu0 %v393_v10 }
  0x49   : > { %1353 = vmatprep.mubr.bf16.mxu0 %v394_v11 }
  0x50   : > { %1354 = vmatmul.mubr.bf16.gmra.mrb[20].mxu0 %v395_v12 }
  0x51   : > { %1357 = vmatprep.mubr.bf16.mxu0 %v396_v13 }
  0x58   : > { %1358 = vmatmul.mubr.bf16.gmra.mrb[24].mxu0 %v397_v14 }
  0x59   : > { %1361 = vmatprep.mubr.bf16.mxu0 %v398_v15 }
  0x60   : > { %1362 = vmatmul.mubr.bf16.gmra.mrb[28].mxu0 %v399_v16 }
  0xfb   : > { %v1335_v21 = vpop.f32.mrb[0].mxu0 }
  0xfc   : > { %v514_v22 = vadd.f32 %v1335_v21, %v1650_v20  ;;  %v505_v23 = vpop.f32.mrb[1].mxu0 }
  0xfd   : > { %v506_v24 = vadd.f32 %v1650_v20, %v505_v23  ;;  %v1336_v25 = vpop.f32.mrb[2].mxu0 }
  0xfe   : > { %v517_v26 = vadd.f32 %v1336_v25, %v1650_v20  ;;  %v508_v27 = vpop.f32.mrb[3].mxu0  ;;  %v634_v29 = vmax.f32 %v514_v22, 0.0 }
  0xff   : > { %v509_v28 = vadd.f32 %v1650_v20, %v508_v27  ;;  %v632_v31 = vmax.f32 %v506_v24, 0.0 }
 0x100   : > { %v635_v30 = vmax.f32 %v517_v26, 0.0 }
 0x101   : > { %v633_v32 = vmax.f32 %v509_v28, 0.0 }
 0x102   : > { %v665_v33 = vpack.c.bf16 %v635_v30, %v634_v29 }
 0x103   : > { %v1339_v34 = vpop.f32.mrb[4].mxu0  ;;  %v664_v35 = vpack.c.bf16 %v633_v32, %v632_v31 }
 0x104   : > { %v530_v36 = vadd.f32 %v1339_v34, %v1650_v20  ;;  %v521_v37 = vpop.f32.mrb[5].mxu0 }
 0x105   : > { %v522_v38 = vadd.f32 %v1650_v20, %v521_v37  ;;  %v1340_v39 = vpop.f32.mrb[6].mxu0  ;;  %1381 = vmatprep.mubr.bf16.mxu1 %v664_v35 }
 0x106   : > { %v638_v40 = vmax.f32 %v530_v36, 0.0  ;;  %v533_v41 = vadd.f32 %v1340_v39, %v1650_v20  ;;  %v524_v42 = vpop.f32.mrb[7].mxu0  ;;  %1382 = vmatmul.mubr.bf16.vlgmr.msra.gmra.mrb[0].mxu1 %v665_v33 }
 0x107   : > { %v525_v43 = vadd.f32 %v1650_v20, %v524_v42  ;;  %v636_v45 = vmax.f32 %v522_v38, 0.0 }
 0x108   : > { %v639_v44 = vmax.f32 %v533_v41, 0.0 }
 0x109   : > { %v637_v46 = vmax.f32 %v525_v43, 0.0 }
 0x10a   : > { %v667_v47 = vpack.c.bf16 %v639_v44, %v638_v40 }
 0x10b   : > { %v666_v48 = vpack.c.bf16 %v637_v46, %v636_v45  ;;  %v1343_v49 = vpop.f32.mrb[8].mxu0 }
 0x10c   : > { %v546_v50 = vadd.f32 %v1343_v49, %v1650_v20  ;;  %v537_v51 = vpop.f32.mrb[9].mxu0 }
 0x10d   : > { %1385 = vmatprep.mubr.bf16.mxu1 %v666_v48  ;;  %v538_v52 = vadd.f32 %v1650_v20, %v537_v51  ;;  %v1344_v53 = vpop.f32.mrb[10].mxu0 }
 0x10e   : > { %v642_v54 = vmax.f32 %v546_v50, 0.0  ;;  %1386 = vmatmul.mubr.bf16.gmra.mrb[4].mxu1 %v667_v47  ;;  %v549_v55 = vadd.f32 %v1344_v53, %v1650_v20  ;;  %v540_v56 = vpop.f32.mrb[11].mxu0 }
 0x10f   : > { %v640_v57 = vmax.f32 %v538_v52, 0.0  ;;  %v541_v58 = vadd.f32 %v1650_v20, %v540_v56 }
 0x110   : > { %v643_v59 = vmax.f32 %v549_v55, 0.0 }
 0x111   : > { %v641_v60 = vmax.f32 %v541_v58, 0.0 }
 0x112   : > { %v669_v61 = vpack.c.bf16 %v643_v59, %v642_v54 }
 0x113   : > { %v668_v62 = vpack.c.bf16 %v641_v60, %v640_v57  ;;  %v1347_v63 = vpop.f32.mrb[12].mxu0 }
 0x114   : > { %v562_v0 = vadd.f32 %v1347_v63, %v1650_v20  ;;  %v553_v1 = vpop.f32.mrb[13].mxu0 }
 0x115   : > { %1389 = vmatprep.mubr.bf16.mxu1 %v668_v62  ;;  %v554_v2 = vadd.f32 %v1650_v20, %v553_v1  ;;  %v1348_v3 = vpop.f32.mrb[14].mxu0 }
 0x116   : > { %1390 = vmatmul.mubr.bf16.gmra.mrb[8].mxu1 %v669_v61  ;;  %v646_v4 = vmax.f32 %v562_v0, 0.0  ;;  %v565_v6 = vadd.f32 %v1348_v3, %v1650_v20  ;;  %v556_v7 = vpop.f32.mrb[15].mxu0 }
 0x117   : > { %v644_v8 = vmax.f32 %v554_v2, 0.0  ;;  %v557_v9 = vadd.f32 %v1650_v20, %v556_v7 }
 0x118   : > { %v647_v10 = vmax.f32 %v565_v6, 0.0 }
 0x119   : > { %v645_v11 = vmax.f32 %v557_v9, 0.0 }
 0x11a   : > { %v671_v12 = vpack.c.bf16 %v647_v10, %v646_v4 }
 0x11b   : > { %v670_v13 = vpack.c.bf16 %v645_v11, %v644_v8  ;;  %v1351_v14 = vpop.f32.mrb[16].mxu0  ;;  %v1687_v8 = vld [vmem:[%s1809_s4] ss:$0 sm:$0xff] }
 0x11c   : > { %v578_v15 = vadd.f32 %v1351_v14, %v1650_v20  ;;  %v569_v16 = vpop.f32.mrb[17].mxu0 }
 0x11d   : > { %v570_v17 = vadd.f32 %v1650_v20, %v569_v16  ;;  %1393 = vmatprep.mubr.bf16.mxu1 %v670_v13  ;;  %v1352_v18 = vpop.f32.mrb[18].mxu0 }
 0x11e   : > { %v650_v19 = vmax.f32 %v578_v15, 0.0  ;;  %v581_v21 = vadd.f32 %v1352_v18, %v1650_v20  ;;  %1394 = vmatmul.mubr.bf16.gmra.mrb[12].mxu1 %v671_v12  ;;  %v572_v22 = vpop.f32.mrb[19].mxu0 }
 0x11f   : > { %v648_v23 = vmax.f32 %v570_v17, 0.0  ;;  %v573_v24 = vadd.f32 %v1650_v20, %v572_v22 }
 0x120   : > { %v651_v25 = vmax.f32 %v581_v21, 0.0 }
 0x121   : > { %v649_v26 = vmax.f32 %v573_v24, 0.0 }
 0x122   : > { %v673_v27 = vpack.c.bf16 %v651_v25, %v650_v19 }
 0x123   : > { %v672_v28 = vpack.c.bf16 %v649_v26, %v648_v23  ;;  %v1355_v29 = vpop.f32.mrb[20].mxu0 }
 0x124   : > { %v594_v30 = vadd.f32 %v1355_v29, %v1650_v20  ;;  %v585_v31 = vpop.f32.mrb[21].mxu0 }
 0x125   : > { %1397 = vmatprep.mubr.bf16.mxu1 %v672_v28  ;;  %v586_v32 = vadd.f32 %v1650_v20, %v585_v31  ;;  %v1356_v33 = vpop.f32.mrb[22].mxu0 }
 0x126   : > { %v654_v34 = vmax.f32 %v594_v30, 0.0  ;;  %1398 = vmatmul.mubr.bf16.gmra.mrb[16].mxu1 %v673_v27  ;;  %v597_v35 = vadd.f32 %v1356_v33, %v1650_v20  ;;  %v588_v36 = vpop.f32.mrb[23].mxu0 }
 0x127   : > { %v652_v37 = vmax.f32 %v586_v32, 0.0  ;;  %v589_v38 = vadd.f32 %v1650_v20, %v588_v36 }
 0x128   : > { %v655_v39 = vmax.f32 %v597_v35, 0.0 }
 0x129   : > { %v653_v40 = vmax.f32 %v589_v38, 0.0 }
 0x12a   : > { %v675_v41 = vpack.c.bf16 %v655_v39, %v654_v34 }
 0x12b   : > { %v674_v42 = vpack.c.bf16 %v653_v40, %v652_v37  ;;  %v1359_v43 = vpop.f32.mrb[24].mxu0 }
 0x12c   : > { %v610_v44 = vadd.f32 %v1359_v43, %v1650_v20  ;;  %v601_v45 = vpop.f32.mrb[25].mxu0 }
 0x12d   : > { %1401 = vmatprep.mubr.bf16.mxu1 %v674_v42  ;;  %v602_v46 = vadd.f32 %v1650_v20, %v601_v45  ;;  %v1360_v47 = vpop.f32.mrb[26].mxu0 }
 0x12e   : > { %1402 = vmatmul.mubr.bf16.gmra.mrb[20].mxu1 %v675_v41  ;;  %v658_v48 = vmax.f32 %v610_v44, 0.0  ;;  %v613_v49 = vadd.f32 %v1360_v47, %v1650_v20  ;;  %v604_v50 = vpop.f32.mrb[27].mxu0 }
 0x12f   : > { %v656_v51 = vmax.f32 %v602_v46, 0.0  ;;  %v605_v52 = vadd.f32 %v1650_v20, %v604_v50 }
 0x130   : > { %v659_v53 = vmax.f32 %v613_v49, 0.0 }
 0x131   : > { %v657_v54 = vmax.f32 %v605_v52, 0.0 }
 0x132   : > { %v677_v55 = vpack.c.bf16 %v659_v53, %v658_v48 }
 0x133   : > { %v676_v56 = vpack.c.bf16 %v657_v54, %v656_v51  ;;  %v1363_v57 = vpop.f32.mrb[28].mxu0 }
 0x134   : > { %v626_v58 = vadd.f32 %v1363_v57, %v1650_v20  ;;  %v617_v59 = vpop.f32.mrb[29].mxu0 }
 0x135   : > { %1405 = vmatprep.mubr.bf16.mxu1 %v676_v56  ;;  %v618_v60 = vadd.f32 %v1650_v20, %v617_v59  ;;  %v1364_v61 = vpop.f32.mrb[30].mxu0 }
 0x136   : > { %1406 = vmatmul.mubr.bf16.gmra.mrb[24].mxu1 %v677_v55  ;;  %v662_v62 = vmax.f32 %v626_v58, 0.0  ;;  %v629_v63 = vadd.f32 %v1364_v61, %v1650_v20  ;;  %v620_v0 = vpop.f32.mrb[31].mxu0 }
 0x137   : > { %v660_v1 = vmax.f32 %v618_v60, 0.0  ;;  %v621_v2 = vadd.f32 %v1650_v20, %v620_v0  ;;  %v1694_v20 = vld [vmem:[%s1810_s5] ss:$0 sm:$0xff] }
 0x138   : > { %v663_v3 = vmax.f32 %v629_v63, 0.0 }
 0x139   : > { %v661_v4 = vmax.f32 %v621_v2, 0.0 }
 0x13a   : > { %v679_v6 = vpack.c.bf16 %v663_v3, %v662_v62 }
 0x13b   : > { %v678_v7 = vpack.c.bf16 %v661_v4, %v660_v1 }
 0x13d   : > { %1409 = vmatprep.mubr.bf16.mxu1 %v678_v7 }
 0x13e   : > { %1410 = vmatmul.mubr.bf16.gmra.mrb[28].mxu1 %v679_v6 }
 0x1d9   : > { %v1383_v9 = vpop.f32.mrb[0].mxu1 }
 0x1da   : > { %v794_v10 = vadd.f32 %v1383_v9, %v1687_v8  ;;  %v785_v11 = vpop.f32.mrb[1].mxu1 }
 0x1db   : > { %v786_v12 = vadd.f32 %v1687_v8, %v785_v11  ;;  %v1384_v13 = vpop.f32.mrb[2].mxu1 }
 0x1dc   : > { %v914_v14 = vmax.f32 %v794_v10, 0.0  ;;  %v797_v15 = vadd.f32 %v1384_v13, %v1687_v8  ;;  %v788_v16 = vpop.f32.mrb[3].mxu1 }
 0x1dd   : > { %v912_v17 = vmax.f32 %v786_v12, 0.0  ;;  %v789_v18 = vadd.f32 %v1687_v8, %v788_v16 }
 0x1de   : > { %v915_v19 = vmax.f32 %v797_v15, 0.0  ;;  %v953_v21 = vmul.f32 %v1694_v20, %v914_v14 }
 0x1df   : > { %v913_v22 = vmax.f32 %v789_v18, 0.0  ;;  %v951_v23 = vmul.f32 %v1694_v20, %v912_v17 }
 0x1e0   : > { %v990_v24 = vsel %vm983_vm2, %v953_v21, 0.0  ;;  %v954_v25 = vmul.f32 %v1694_v20, %v915_v19 }
 0x1e1   : > { %991 = vadd.xlane.f32.xlu1 %v990_v24  ;;  %v1387_v26 = vpop.f32.mrb[4].mxu1  ;;  %v984_v27 = vsel %vm983_vm2, %v951_v23, 0.0  ;;  %v952_v28 = vmul.f32 %v1694_v20, %v913_v22 }
 0x1e2   : > { %v810_v29 = vadd.f32 %v1387_v26, %v1687_v8  ;;  %v801_v30 = vpop.f32.mrb[5].mxu1  ;;  %985 = vadd.xlane.f32.xlu0 %v984_v27  ;;  %v993_v35 = vsel %vm983_vm2, %v954_v25, 0.0 }
 0x1e3   : > { %v802_v31 = vadd.f32 %v1687_v8, %v801_v30  ;;  %v1388_v32 = vpop.f32.mrb[6].mxu1  ;;  %v987_v38 = vsel %vm983_vm2, %v952_v28, 0.0 }
 0x1e4   : > { %v918_v33 = vmax.f32 %v810_v29, 0.0  ;;  %v804_v34 = vpop.f32.mrb[7].mxu1  ;;  %v813_v37 = vadd.f32 %v1388_v32, %v1687_v8 }
 0x1e5   : > { %v916_v36 = vmax.f32 %v802_v31, 0.0  ;;  %994 = vadd.xlane.f32.xlu1 %v993_v35  ;;  %v805_v42 = vadd.f32 %v1687_v8, %v804_v34 }
 0x1e6   : > { %988 = vadd.xlane.f32.xlu0 %v987_v38  ;;  %v957_v39 = vmul.f32 %v1694_v20, %v918_v33  ;;  %v919_v41 = vmax.f32 %v813_v37, 0.0 }
 0x1e7   : > { %v955_v44 = vmul.f32 %v1694_v20, %v916_v36  ;;  %v917_v48 = vmax.f32 %v805_v42, 0.0 }
 0x1e8   : > { %v1002_v40 = vsel %vm983_vm2, %v957_v39, 0.0  ;;  %v958_v51 = vmul.f32 %v1694_v20, %v919_v41 }
 0x1e9   : > { %v1391_v43 = vpop.f32.mrb[8].mxu1  ;;  %v996_v50 = vsel %vm983_vm2, %v955_v44, 0.0  ;;  %v956_v55 = vmul.f32 %v1694_v20, %v917_v48 }
 0x1ea   : > { %1003 = vadd.xlane.f32.xlu0 %v1002_v40  ;;  %v817_v45 = vpop.f32.mrb[9].mxu1  ;;  %v826_v49 = vadd.f32 %v1391_v43, %v1687_v8  ;;  %v1005_v54 = vsel %vm983_vm2, %v958_v51, 0.0 }
 0x1eb   : > { %v1392_v46 = vpop.f32.mrb[10].mxu1  ;;  %v818_v53 = vadd.f32 %v1687_v8, %v817_v45  ;;  %v999_v62 = vsel %vm983_vm2, %v956_v55, 0.0 }
 0x1ec   : > { %v820_v47 = vpop.f32.mrb[11].mxu1  ;;  %v922_v52 = vmax.f32 %v826_v49, 0.0  ;;  %v829_v61 = vadd.f32 %v1392_v46, %v1687_v8 }
 0x1ed   : > { %v920_v60 = vmax.f32 %v818_v53, 0.0  ;;  %v821_v0 = vadd.f32 %v1687_v8, %v820_v47 }
 0x1ee   : > { %997 = vadd.xlane.f32.xlu0 %v996_v50  ;;  %v961_v63 = vmul.f32 %v1694_v20, %v922_v52  ;;  %v923_v1 = vmax.f32 %v829_v61, 0.0 }
 0x1ef   : > { %v959_v3 = vmul.f32 %v1694_v20, %v920_v60  ;;  %v921_v9 = vmax.f32 %v821_v0, 0.0 }
 0x1f0   : > { %v1014_v2 = vsel %vm983_vm2, %v961_v63, 0.0  ;;  %v962_v14 = vmul.f32 %v1694_v20, %v923_v1 }
 0x1f1   : > { %v1395_v56 = vpop.f32.mrb[12].mxu1  ;;  %v1008_v13 = vsel %vm983_vm2, %v959_v3, 0.0  ;;  %v960_v18 = vmul.f32 %v1694_v20, %v921_v9 }
 0x1f2   : > { %1006 = vadd.xlane.f32.xlu0 %v1005_v54  ;;  %v833_v57 = vpop.f32.mrb[13].mxu1  ;;  %v842_v12 = vadd.f32 %v1395_v56, %v1687_v8  ;;  %v1017_v23 = vsel %vm983_vm2, %v962_v14, 0.0 }
 0x1f3   : > { %v1396_v58 = vpop.f32.mrb[14].mxu1  ;;  %v834_v22 = vadd.f32 %v1687_v8, %v833_v57  ;;  %v1011_v31 = vsel %vm983_vm2, %v960_v18, 0.0 }
 0x1f4   : > { %v836_v59 = vpop.f32.mrb[15].mxu1  ;;  %v926_v21 = vmax.f32 %v842_v12, 0.0  ;;  %v845_v37 = vadd.f32 %v1396_v58, %v1687_v8 }
 0x1f5   : > { %v924_v36 = vmax.f32 %v834_v22, 0.0  ;;  %v837_v41 = vadd.f32 %v1687_v8, %v836_v59 }
 0x1f6   : > { %1000 = vadd.xlane.f32.xlu0 %v999_v62  ;;  %v965_v38 = vmul.f32 %v1694_v20, %v926_v21  ;;  %v927_v46 = vmax.f32 %v845_v37, 0.0 }
 0x1f7   : > { %v963_v48 = vmul.f32 %v1694_v20, %v924_v36  ;;  %v925_v51 = vmax.f32 %v837_v41, 0.0 }
 0x1f8   : > { %v1026_v47 = vsel %vm983_vm2, %v965_v38, 0.0  ;;  %v966_v61 = vmul.f32 %v1694_v20, %v927_v46 }
 0x1f9   : > { %v1399_v4 = vpop.f32.mrb[16].mxu1  ;;  %v1020_v60 = vsel %vm983_vm2, %v963_v48, 0.0  ;;  %v964_v0 = vmul.f32 %v1694_v20, %v925_v51 }
 0x1fa   : > { %1015 = vadd.xlane.f32.xlu0 %v1014_v2  ;;  %v1725_v6 = vpop.f32.mrb[17].mxu1  ;;  %v858_v59 = vadd.f32 %v1399_v4, %v1687_v8  ;;  %v1029_v12 = vsel %vm983_vm2, %v966_v61, 0.0 }
 0x1fb   : > { %v1400_v7 = vpop.f32.mrb[18].mxu1  ;;  %v1023_v18 = vsel %vm983_vm2, %v964_v0, 0.0 }
 0x1fc   : > { %v861_v10 = vadd.f32 %v1400_v7, %v1687_v8  ;;  %v852_v11 = vpop.f32.mrb[19].mxu1 }
 0x1fd   : > { %v853_v15 = vadd.f32 %v1687_v8, %v852_v11  ;;  %v850_v11 = vadd.f32 %v1687_v8, %v1725_v6 }
 0x1fe   : > { %1009 = vadd.xlane.f32.xlu0 %v1008_v13  ;;  %v931_v16 = vmax.f32 %v861_v10, 0.0  ;;  %v930_v10 = vmax.f32 %v858_v59, 0.0 }
 0x1ff   : > { %v929_v17 = vmax.f32 %v853_v15, 0.0 }
 0x200   : > { %v970_v19 = vmul.f32 %v1694_v20, %v931_v16 }
 0x201   : > { %v1403_v24 = vpop.f32.mrb[20].mxu1  ;;  %v968_v25 = vmul.f32 %v1694_v20, %v929_v17 }
 0x202   : > { %1018 = vadd.xlane.f32.xlu0 %v1017_v23  ;;  %v1041_v26 = vsel %vm983_vm2, %v970_v19, 0.0  ;;  %v874_v27 = vadd.f32 %v1403_v24, %v1687_v8  ;;  %v865_v28 = vpop.f32.mrb[21].mxu1 }
 0x203   : > { %1042 = vadd.xlane.f32.xlu1 %v1041_v26  ;;  %v866_v29 = vadd.f32 %v1687_v8, %v865_v28  ;;  %v1404_v30 = vpop.f32.mrb[22].mxu1  ;;  %v1035_v33 = vsel %vm983_vm2, %v968_v25, 0.0  ;;  %v928_v28 = vmax.f32 %v850_v11, 0.0 }
 0x204   : > { %v934_v32 = vmax.f32 %v874_v27, 0.0  ;;  %v877_v34 = vadd.f32 %v1404_v30, %v1687_v8  ;;  %v868_v35 = vpop.f32.mrb[23].mxu1 }
 0x205   : > { %v932_v39 = vmax.f32 %v866_v29, 0.0  ;;  %v869_v42 = vadd.f32 %v1687_v8, %v868_v35  ;;  %v969_v29 = vmul.f32 %v1694_v20, %v930_v10 }
 0x206   : > { %1012 = vadd.xlane.f32.xlu0 %v1011_v31  ;;  %v973_v40 = vmul.f32 %v1694_v20, %v934_v32  ;;  %v935_v43 = vmax.f32 %v877_v34, 0.0 }
 0x207   : > { %1036 = vadd.xlane.f32.xlu1 %v1035_v33  ;;  %v971_v45 = vmul.f32 %v1694_v20, %v932_v39  ;;  %v933_v52 = vmax.f32 %v869_v42, 0.0 }
 0x208   : > { %v1050_v44 = vsel %vm983_vm2, %v973_v40, 0.0  ;;  %v974_v56 = vmul.f32 %v1694_v20, %v935_v43  ;;  %v1038_v40 = vsel %vm983_vm2, %v969_v29, 0.0 }
 0x209   : > { %v1407_v49 = vpop.f32.mrb[24].mxu1  ;;  %v1044_v54 = vsel %vm983_vm2, %v971_v45, 0.0  ;;  %v972_v1 = vmul.f32 %v1694_v20, %v933_v52 }
 0x20a   : > { %1027 = vadd.xlane.f32.xlu0 %v1026_v47  ;;  %v881_v50 = vpop.f32.mrb[25].mxu1  ;;  %v890_v55 = vadd.f32 %v1407_v49, %v1687_v8  ;;  %v1053_v7 = vsel %vm983_vm2, %v974_v56, 0.0  ;;  %v1793_v47 = vpop.permute.xlu1 %1147 }
 0x20b   : > { %1051 = vadd.xlane.f32.xlu1 %v1050_v44  ;;  %v1408_v53 = vpop.f32.mrb[26].mxu1  ;;  %v882_v9 = vadd.f32 %v1687_v8, %v881_v50  ;;  %v1047_v19 = vsel %vm983_vm2, %v972_v1, 0.0 }
 0x20c   : > { %v893_v57 = vadd.f32 %v1408_v53, %v1687_v8  ;;  %v884_v58 = vpop.f32.mrb[27].mxu1  ;;  %v938_v3 = vmax.f32 %v890_v55, 0.0 }
 0x20d   : > { %v885_v62 = vadd.f32 %v1687_v8, %v884_v58  ;;  %v936_v23 = vmax.f32 %v882_v9, 0.0 }
 0x20e   : > { %1021 = vadd.xlane.f32.xlu0 %v1020_v60  ;;  %v939_v63 = vmax.f32 %v893_v57, 0.0  ;;  %v977_v24 = vmul.f32 %v1694_v20, %v938_v3 }
 0x20f   : > { %1045 = vadd.xlane.f32.xlu1 %v1044_v54  ;;  %v937_v2 = vmax.f32 %v885_v62, 0.0  ;;  %v975_v37 = vmul.f32 %v1694_v20, %v936_v23 }
 0x210   : > { %v978_v4 = vmul.f32 %v1694_v20, %v939_v63  ;;  %v1062_v36 = vsel %vm983_vm2, %v977_v24, 0.0 }
 0x211   : > { %v1411_v13 = vpop.f32.mrb[28].mxu1  ;;  %v976_v14 = vmul.f32 %v1694_v20, %v937_v2  ;;  %v1056_v45 = vsel %vm983_vm2, %v975_v37, 0.0 }
 0x212   : > { %1030 = vadd.xlane.f32.xlu0 %v1029_v12  ;;  %v906_v15 = vadd.f32 %v1411_v13, %v1687_v8  ;;  %v1065_v16 = vsel %vm983_vm2, %v978_v4, 0.0  ;;  %v897_v17 = vpop.f32.mrb[29].mxu1 }
 0x213   : > { %1054 = vadd.xlane.f32.xlu1 %v1053_v7  ;;  %v898_v21 = vadd.f32 %v1687_v8, %v897_v17  ;;  %v1059_v6 = vsel %vm983_vm2, %v976_v14, 0.0  ;;  %v1412_v22 = vpop.f32.mrb[30].mxu1 }
 0x214   : > { %v942_v25 = vmax.f32 %v906_v15, 0.0  ;;  %v909_v26 = vadd.f32 %v1412_v22, %v1687_v8  ;;  %v900_v27 = vpop.f32.mrb[31].mxu1 }
 0x215   : > { %v940_v30 = vmax.f32 %v898_v21, 0.0  ;;  %v901_v31 = vadd.f32 %v1687_v8, %v900_v27  ;;  %v967_v8 = vmul.f32 %v1694_v20, %v928_v28  ;;  %v1454_v27 = vmov 1966171168  }
 0x216   : > { %1024 = vadd.xlane.f32.xlu0 %v1023_v18  ;;  %v943_v32 = vmax.f32 %v909_v26, 0.0  ;;  %v981_v33 = vmul.f32 %v1694_v20, %v942_v25  ;;  %v1150_v18 = vlaneseq  ;;  %v1168_v28 = vunpack.c.l.s4 %v1454_v27 }
 0x217   : > { %1048 = vadd.xlane.f32.xlu1 %v1047_v19  ;;  %v941_v34 = vmax.f32 %v901_v31, 0.0  ;;  %v979_v35 = vmul.f32 %v1694_v20, %v940_v30  ;;  %v1032_v46 = vsel %vm983_vm2, %v967_v8, 0.0 }
 0x218   : > { %v1074_v38 = vsel %vm983_vm2, %v981_v33, 0.0  ;;  %v982_v39 = vmul.f32 %v1694_v20, %v943_v32  ;;  %v1151_v19 = vshrl.u32 %v1150_v18, 7  ;;  %v1169_v30 = vunpack.c.0.s8 %v1168_v28 }
 0x219   : > { %v1068_v41 = vsel %vm983_vm2, %v979_v35, 0.0  ;;  %v980_v42 = vmul.f32 %v1694_v20, %v941_v34  ;;  %vm1184_vm3 = vcmp.lt.s32.totalorder %v1150_v18, 256 }
 0x21a   : > { %1039 = vadd.xlane.f32.xlu0 %v1038_v40  ;;  %v1077_v43 = vsel %vm983_vm2, %v982_v39, 0.0  ;;  %v1152_v21 = vsub.s32 0, %v1151_v19  ;;  %v1172_v34 = vsub.s32 %v1169_v30, %v1151_v19 }
 0x21b   : > { %1063 = vadd.xlane.f32.xlu1 %v1062_v36  ;;  %v1071_v44 = vsel %vm983_vm2, %v980_v42, 0.0 }
 0x21c   : > { %v1153_v22 = vrot.slane %v1793_v47, %v1152_v21 }
 0x21e   : > { %1033 = vadd.xlane.f32.xlu0 %v1032_v46 }
 0x21f   : > { %1057 = vadd.xlane.f32.xlu1 %v1056_v45 }
 0x223   : > { %1066 = vadd.xlane.f32.xlu1 %v1065_v16 }
 0x227   : > { %1060 = vadd.xlane.f32.xlu1 %v1059_v6 }
 0x22b   : > { %1075 = vadd.xlane.f32.xlu1 %v1074_v38 }
 0x22f   : > { %1069 = vadd.xlane.f32.xlu1 %v1068_v41 }
 0x233   : > { %1078 = vadd.xlane.f32.xlu1 %v1077_v43 }
 0x237   : > { %1072 = vadd.xlane.f32.xlu1 %v1071_v44 }
 0x26e   : > { %v992_v49 = vpop.xlane.xlu1 %991 }
 0x26f   : > { %v986_v20 = vpop.xlane.xlu0 %985 }
 0x270   : > { %1080 = vxpose.xlu0.b32.start [1/16] (narrow) %v986_v20, 8 }
 0x272   : > { %v995_v51 = vpop.xlane.xlu1 %994 }
 0x273   : > { %v989_v48 = vpop.xlane.xlu0 %988 }
 0x274   : > { %1081 = vxpose.xlu0.b32.cont [2/16] (narrow) %v989_v48, 8 }
 0x277   : > { %v1004_v50 = vpop.xlane.xlu0 %1003 }
 0x278   : > { %1082 = vxpose.xlu0.b32.cont [3/16] (narrow) %v992_v49, 8 }
 0x27b   : > { %v998_v52 = vpop.xlane.xlu0 %997 }
 0x27c   : > { %1083 = vxpose.xlu0.b32.cont [4/16] (narrow) %v995_v51, 8 }
 0x27f   : > { %v1007_v53 = vpop.xlane.xlu0 %1006 }
 0x280   : > { %1084 = vxpose.xlu0.b32.cont [5/16] (narrow) %v998_v52, 8 }
 0x283   : > { %v1001_v54 = vpop.xlane.xlu0 %1000 }
 0x284   : > { %1085 = vxpose.xlu0.b32.cont [6/16] (narrow) %v1001_v54, 8 }
 0x287   : > { %v1016_v55 = vpop.xlane.xlu0 %1015 }
 0x288   : > { %1086 = vxpose.xlu0.b32.cont [7/16] (narrow) %v1004_v50, 8 }
 0x28b   : > { %v1010_v56 = vpop.xlane.xlu0 %1009 }
 0x28c   : > { %1087 = vxpose.xlu0.b32.cont [8/16] (narrow) %v1007_v53, 8 }
 0x28f   : > { %v1019_v57 = vpop.xlane.xlu0 %1018 }
 0x290   : > { %1088 = vxpose.xlu0.b32.cont [9/16] (narrow) %v1010_v56, 8  ;;  %v1043_v58 = vpop.xlane.xlu1 %1042 }
 0x293   : > { %v1013_v59 = vpop.xlane.xlu0 %1012 }
 0x294   : > { %1089 = vxpose.xlu0.b32.cont [10/16] (narrow) %v1013_v59, 8  ;;  %v1037_v61 = vpop.xlane.xlu1 %1036 }
 0x297   : > { %v1028_v60 = vpop.xlane.xlu0 %1027 }
 0x298   : > { %1090 = vxpose.xlu0.b32.cont [11/16] (narrow) %v1016_v55, 8  ;;  %v1052_v63 = vpop.xlane.xlu1 %1051 }
 0x29b   : > { %v1022_v62 = vpop.xlane.xlu0 %1021 }
 0x29c   : > { %1091 = vxpose.xlu0.b32.cont [12/16] (narrow) %v1019_v57, 8  ;;  %v1046_v2 = vpop.xlane.xlu1 %1045 }
 0x29f   : > { %v1031_v0 = vpop.xlane.xlu0 %1030 }
 0x2a0   : > { %1092 = vxpose.xlu0.b32.cont [13/16] (narrow) %v1022_v62, 8  ;;  %v1055_v7 = vpop.xlane.xlu1 %1054 }
 0x2a3   : > { %v1025_v1 = vpop.xlane.xlu0 %1024 }
 0x2a4   : > { %1093 = vxpose.xlu0.b32.cont [14/16] (narrow) %v1025_v1, 8  ;;  %v1049_v4 = vpop.xlane.xlu1 %1048 }
 0x2a7   : > { %v1040_v3 = vpop.xlane.xlu0 %1039 }
 0x2a8   : > { %1094 = vxpose.xlu0.b32.cont [15/16] (narrow) %v1028_v60, 8  ;;  %v1064_v10 = vpop.xlane.xlu1 %1063 }
 0x2ab   : > { %v1034_v9 = vpop.xlane.xlu0 %1033 }
 0x2ac   : > { %1095 = vxpose.xlu0.b32.end [16/16] (narrow) %v1031_v0, 8  ;;  %1112 = vxpose.xlu1.b32.start [1/16] (narrow) %v1034_v9, 8  ;;  %v1058_v11 = vpop.xlane.xlu1 %1057 }
 0x2b0   : > { %1113 = vxpose.xlu1.b32.cont [2/16] (narrow) %v1037_v61, 8  ;;  %v1067_v12 = vpop.xlane.xlu1 %1066 }
 0x2b4   : > { %1114 = vxpose.xlu1.b32.cont [3/16] (narrow) %v1040_v3, 8  ;;  %v1061_v13 = vpop.xlane.xlu1 %1060 }
 0x2b8   : > { %1115 = vxpose.xlu1.b32.cont [4/16] (narrow) %v1043_v58, 8  ;;  %v1076_v14 = vpop.xlane.xlu1 %1075 }
 0x2bc   : > { %1116 = vxpose.xlu1.b32.cont [5/16] (narrow) %v1046_v2, 8  ;;  %v1070_v15 = vpop.xlane.xlu1 %1069 }
 0x2c0   : > { %1117 = vxpose.xlu1.b32.cont [6/16] (narrow) %v1049_v4, 8  ;;  %v1079_v16 = vpop.xlane.xlu1 %1078 }
 0x2c4   : > { %1118 = vxpose.xlu1.b32.cont [7/16] (narrow) %v1052_v63, 8  ;;  %v1073_v17 = vpop.xlane.xlu1 %1072 }
 0x2c8   : > { %1119 = vxpose.xlu1.b32.cont [8/16] (narrow) %v1055_v7, 8 }
 0x2cc   : > { %1120 = vxpose.xlu1.b32.cont [9/16] (narrow) %v1058_v11, 8 }
 0x2d0   : > { %1121 = vxpose.xlu1.b32.cont [10/16] (narrow) %v1061_v13, 8 }
 0x2d4   : > { %1122 = vxpose.xlu1.b32.cont [11/16] (narrow) %v1064_v10, 8 }
 0x2d5   : > { %1424 = vset.pattern.permute.xlu0 %v1453_v5 }
 0x2d8   : > { %1123 = vxpose.xlu1.b32.cont [12/16] (narrow) %v1067_v12, 8 }
 0x2dc   : > { %1124 = vxpose.xlu1.b32.cont [13/16] (narrow) %v1070_v15, 8 }
 0x2e0   : > { %1125 = vxpose.xlu1.b32.cont [14/16] (narrow) %v1073_v17, 8 }
 0x2e4   : > { %1126 = vxpose.xlu1.b32.cont [15/16] (narrow) %v1076_v14, 8 }
 0x2e8   : > { %1127 = vxpose.xlu1.b32.end [16/16] (narrow) %v1079_v16, 8 }
 0x2f0   : > { %v1096_v6 = vpop.trf.xlu0 }
 0x2f1   : > { %v1154_v23 = vadd.f32 %v1153_v22, %v1096_v6 }
 0x2f3   : > { %v1156_v24 = vmul.f32 0.5, %v1154_v23 }
 0x2f5   : > { %1441 = vtanh.f32 %v1156_v24 }
 0x2ff   : > { %v1442_v29 = vpop.eup %1441 }
 0x300   : > { %v1160_v31 = vadd.f32 1.0, %v1442_v29 }
 0x302   : > { %v1162_v35 = vmul.f32 0.5, %v1160_v31 }
 0x32c   : > { %v1128_v25 = vpop.trf.xlu1 }
 0x32d   : > { %v1155_v5 = vadd.f32 %v1153_v22, %v1128_v25 }
 0x32f   : > { %v1157_v26 = vmul.f32 0.5, %v1155_v5 }
 0x331   : > { %1443 = vtanh.f32 %v1157_v26 }
 0x33b   : > { %v1444_v32 = vpop.eup %1443 }
 0x33c   : > { %v1161_v33 = vadd.f32 1.0, %v1444_v32 }
 0x33e   : > { %v1163_v36 = vmul.f32 0.5, %v1161_v33 }
 0x340   : > { %v1166_v37 = vcombine.low %v1162_v35, %v1163_v36 }
 0x342   : > { %v1173_v38 = vrot.slane %v1166_v37, %v1172_v34 }
 0x344   : > { %v1180_v39 = vrot.slane %v1173_v38, %v1172_v34 }
 0x346   : > { %1186 = vst.msk [vmem:[%s300_s6] sm:$0x3] %vm1184_vm3, %v1180_v39 }
 0x347 PF: > { %s19_s26 = sadd.s32 1, %s1451_s26  }
 0x348   : > { %p16_p5 = scmp.ge.s32.totalorder %s19_s26, 4  }
 0x34a   :  { %18 = sbr.rel (!%p16_p5) target bundleno = 3 (0x3), region = 78 }

</bundles_post_ra>
